<compile_context>
chip_gen: v7x
topology: tpu7x:2x2x1
jax: 0.10.0
libtpu: 0.0.40
codegen_flags: <defaults>
</compile_context>

<pallas_src>
import jax
import jax.numpy as jnp
from jax.experimental import pallas as pl
from jax.experimental.pallas import tpu as pltpu

INPUT_NC = 4          # in_dims of the first MLP block
NDF = 8               # out_dims of block 1 / in_dims of block 2
OUT_NC = NDF * 2      # out_dims of block 2
LN_EPS = 1e-5
LANE = 128


def _mlp_block_t(x, p, n_in):
    """One Linear -> LayerNorm -> ReLU block in transposed [features, M] layout.

    x: (n_in, tm) fp32 activations.
    p: (n_out, n_in + 3) packed parameters [W^T | b | gamma | beta].
    returns: (n_out, tm) fp32.
    """
    w = p[:, 0:n_in]                      # (n_out, n_in)
    b = p[:, n_in:n_in + 1]               # (n_out, 1)
    g = p[:, n_in + 1:n_in + 2]           # (n_out, 1)
    be = p[:, n_in + 2:n_in + 3]          # (n_out, 1)

    # Linear as unrolled VPU broadcast-FMAs: h[j, :] = b[j] + sum_k w[j, k] * x[k, :]
    h = b + w[:, 0:1] * x[0:1, :]
    for k in range(1, n_in):
        h = h + w[:, k:k + 1] * x[k:k + 1, :]

    # LayerNorm over the feature (sublane) axis, gamma folded into the scale.
    mu = jnp.mean(h, axis=0, keepdims=True)          # (1, tm)   XLU reduce
    c = h - mu
    var = jnp.mean(c * c, axis=0, keepdims=True)     # (1, tm)
    scale = g * jax.lax.rsqrt(var + LN_EPS)          # (n_out, tm), rsqrt -> EUP
    return jnp.maximum(c * scale + be, 0.0)          # ReLU


def _projector_kernel(x_ref, p1_ref, p2_ref, o_ref):
    x = x_ref[...].astype(jnp.float32)               # (INPUT_NC, tm)
    h = _mlp_block_t(x, p1_ref[...], INPUT_NC)       # (NDF, tm)
    y = _mlp_block_t(h, p2_ref[...], NDF)            # (OUT_NC, tm)
    o_ref[...] = y.astype(o_ref.dtype)


def _pick_tm(m, tm_max=32768, min_blocks=2):
    """Lane-dense tile size: multiple of 128, capped, >= min_blocks grid steps."""
    if m <= LANE:
        return m                                      # single tiny block (full extent)
    n_blocks = max(min_blocks, pl.cdiv(m, tm_max))    # feed both v7x TensorCores
    tm = pl.cdiv(pl.cdiv(m, n_blocks), LANE) * LANE
    return min(tm, tm_max)


def _pack_params(params):
    """Pack (w, b, gamma, beta) per layer into one (n_out, n_in+3) fp32 slab."""
    w1, b1, g1, be1, w2, b2, g2, be2 = params

    def pack(w, b, g, be):
        cols = [w.T] + [a.reshape(-1, 1) for a in (b, g, be)]
        return jnp.concatenate(cols, axis=1).astype(jnp.float32)

    return pack(w1, b1, g1, be1), pack(w2, b2, g2, be2)


def projector_forward(x, params, *, tm_max=32768, min_blocks=2,
                      out_dtype=jnp.float32):
    """x: [..., INPUT_NC] -> [..., OUT_NC] (matches the chained PyTorch MLP blocks).

    Wrapper-side transpose to/from the lane-dense [features, M] layout is pure
    layout plumbing; there is no pad/slice copy.
    (Set out_dtype=jnp.bfloat16 to cut HBM writeback; compute stays fp32.)
    """
    assert x.shape[-1] == INPUT_NC
    lead = x.shape[:-1]
    x2d = x.reshape(-1, INPUT_NC)
    m = x2d.shape[0]
    xt = x2d.T                                        # (INPUT_NC, m), lane-dense
    p1, p2 = _pack_params(params)

    tm = _pick_tm(m, tm_max, min_blocks)
    grid = (pl.cdiv(m, tm),)                          # ragged last tile is masked

    yt = pl.pallas_call(
        _projector_kernel,
        out_shape=jax.ShapeDtypeStruct((OUT_NC, m), out_dtype),
        grid_spec=pltpu.PrefetchScalarGridSpec(
            num_scalar_prefetch=0,
            grid=grid,
            in_specs=[
                pl.BlockSpec((INPUT_NC, tm), lambda i: (0, i)),       # activations
                pl.BlockSpec((NDF, INPUT_NC + 3), lambda i: (0, 0)),  # layer-1 slab
                pl.BlockSpec((OUT_NC, NDF + 3), lambda i: (0, 0)),    # layer-2 slab
            ],
            out_specs=pl.BlockSpec((OUT_NC, tm), lambda i: (0, i)),
        ),
        compiler_params=pltpu.CompilerParams(
            dimension_semantics=("parallel",),        # megacore-shardable on v7x
        ),
    )(xt, p1, p2)

    return yt.T.reshape(*lead, OUT_NC)


def init_params(key):
    """Deterministic synthetic parameters (shapes from the module __init__)."""
    k = jax.random.split(key, 8)
    in_dims, mid_dims, out_dims = INPUT_NC, NDF, OUT_NC
    # Linear weights stored as (in, out) == torch weight.T; biases / LN params [1, F].
    w1 = jax.random.normal(k[0], (in_dims, mid_dims), jnp.float32) * 0.5
    b1 = jax.random.normal(k[1], (1, mid_dims), jnp.float32) * 0.1
    g1 = 1.0 + 0.1 * jax.random.normal(k[2], (1, mid_dims), jnp.float32)
    be1 = 0.1 * jax.random.normal(k[3], (1, mid_dims), jnp.float32)
    w2 = jax.random.normal(k[4], (mid_dims, out_dims), jnp.float32) * 0.5
    b2 = jax.random.normal(k[5], (1, out_dims), jnp.float32) * 0.1
    g2 = 1.0 + 0.1 * jax.random.normal(k[6], (1, out_dims), jnp.float32)
    be2 = 0.1 * jax.random.normal(k[7], (1, out_dims), jnp.float32)
    return (w1, b1, g1, be1, w2, b2, g2, be2)


def reference_forward(x, params):
    """Pure-JAX reference of the PyTorch forward (channels-last)."""
    w1, b1, g1, be1, w2, b2, g2, be2 = params

    def mlp(x, w, b, g, be):
        h = x @ w + b
        mu = h.mean(-1, keepdims=True)
        var = ((h - mu) ** 2).mean(-1, keepdims=True)
        h = (h - mu) / jnp.sqrt(var + LN_EPS) * g + be
        return jnp.maximum(h, 0.0)

    return mlp(mlp(x, w1, b1, g1, be1), w2, b2, g2, be2)


if __name__ == "__main__":
    key = jax.random.PRNGKey(0)
    kx, kp = jax.random.split(key)

    # NHWC input: batch=2, spatial=16x16, channels=INPUT_NC=4  -> M = 512 rows
    x = jax.random.normal(kx, (2, 16, 16, INPUT_NC), jnp.float32)
    params = init_params(kp)

    fwd = jax.jit(projector_forward)
    out = jax.block_until_ready(fwd(x, params))

    ref = reference_forward(x, params)
    assert out.shape == (2, 16, 16, OUT_NC), out.shape
    err = float(jnp.max(jnp.abs(out - ref)))
    assert err < 1e-4, err

    print("KERNEL_OK")
</pallas_src>

<mosaic_0001>
module attributes {stable_mosaic.version = 11 : i64} {
  func.func @_projector_kernel(%arg0: i32, %arg1: memref<4x256xf32, #tpu.memory_space<vmem>>, %arg2: memref<8x7xf32, #tpu.memory_space<vmem>>, %arg3: memref<16x11xf32, #tpu.memory_space<vmem>>, %arg4: memref<16x256xf32, #tpu.memory_space<vmem>>) attributes {dimension_semantics = [#tpu.dimension_semantics<parallel>], iteration_bounds = array<i64: 2>, scalar_prefetch = 0 : i64, scratch_operands = 0 : i64, tpu.core_type = #tpu.core_type<tc>, window_params = [{transform_indices = @transform_0, window_bounds = array<i64: 4, 256>}, {pipeline_mode = #tpu.pipeline_mode<synchronous>, transform_indices = @transform_1, window_bounds = array<i64: 8, 7>}, {pipeline_mode = #tpu.pipeline_mode<synchronous>, transform_indices = @transform_2, window_bounds = array<i64: 16, 11>}, {transform_indices = @transform_3, window_bounds = array<i64: 16, 256>}]} {
    %c0 = arith.constant 0 : index
    %c0_0 = arith.constant 0 : index
    %0 = vector.load %arg1[%c0, %c0_0] : memref<4x256xf32, #tpu.memory_space<vmem>>, vector<4x256xf32>
    %c0_1 = arith.constant 0 : index
    %c0_2 = arith.constant 0 : index
    %1 = vector.load %arg2[%c0_1, %c0_2] : memref<8x7xf32, #tpu.memory_space<vmem>>, vector<8x7xf32>
    %2 = vector.extract_strided_slice %1 {offsets = [0, 0], sizes = [8, 4], strides = [1, 1]} : vector<8x7xf32> to vector<8x4xf32>
    %3 = vector.extract_strided_slice %1 {offsets = [0, 4], sizes = [8, 1], strides = [1, 1]} : vector<8x7xf32> to vector<8x1xf32>
    %4 = vector.extract_strided_slice %1 {offsets = [0, 5], sizes = [8, 1], strides = [1, 1]} : vector<8x7xf32> to vector<8x1xf32>
    %5 = vector.extract_strided_slice %1 {offsets = [0, 6], sizes = [8, 1], strides = [1, 1]} : vector<8x7xf32> to vector<8x1xf32>
    %6 = vector.extract_strided_slice %2 {offsets = [0, 0], sizes = [8, 1], strides = [1, 1]} : vector<8x4xf32> to vector<8x1xf32>
    %7 = vector.extract_strided_slice %0 {offsets = [0, 0], sizes = [1, 256], strides = [1, 1]} : vector<4x256xf32> to vector<1x256xf32>
    %8 = vector.broadcast %6 : vector<8x1xf32> to vector<8x256xf32>
    %9 = vector.broadcast %7 : vector<1x256xf32> to vector<8x256xf32>
    %10 = arith.mulf %8, %9 : vector<8x256xf32>
    %11 = vector.broadcast %3 : vector<8x1xf32> to vector<8x256xf32>
    %12 = arith.addf %11, %10 : vector<8x256xf32>
    %13 = vector.extract_strided_slice %2 {offsets = [0, 1], sizes = [8, 1], strides = [1, 1]} : vector<8x4xf32> to vector<8x1xf32>
    %14 = vector.extract_strided_slice %0 {offsets = [1, 0], sizes = [1, 256], strides = [1, 1]} : vector<4x256xf32> to vector<1x256xf32>
    %15 = vector.broadcast %13 : vector<8x1xf32> to vector<8x256xf32>
    %16 = vector.broadcast %14 : vector<1x256xf32> to vector<8x256xf32>
    %17 = arith.mulf %15, %16 : vector<8x256xf32>
    %18 = arith.addf %12, %17 : vector<8x256xf32>
    %19 = vector.extract_strided_slice %2 {offsets = [0, 2], sizes = [8, 1], strides = [1, 1]} : vector<8x4xf32> to vector<8x1xf32>
    %20 = vector.extract_strided_slice %0 {offsets = [2, 0], sizes = [1, 256], strides = [1, 1]} : vector<4x256xf32> to vector<1x256xf32>
    %21 = vector.broadcast %19 : vector<8x1xf32> to vector<8x256xf32>
    %22 = vector.broadcast %20 : vector<1x256xf32> to vector<8x256xf32>
    %23 = arith.mulf %21, %22 : vector<8x256xf32>
    %24 = arith.addf %18, %23 : vector<8x256xf32>
    %25 = vector.extract_strided_slice %2 {offsets = [0, 3], sizes = [8, 1], strides = [1, 1]} : vector<8x4xf32> to vector<8x1xf32>
    %26 = vector.extract_strided_slice %0 {offsets = [3, 0], sizes = [1, 256], strides = [1, 1]} : vector<4x256xf32> to vector<1x256xf32>
    %27 = vector.broadcast %25 : vector<8x1xf32> to vector<8x256xf32>
    %28 = vector.broadcast %26 : vector<1x256xf32> to vector<8x256xf32>
    %29 = arith.mulf %27, %28 : vector<8x256xf32>
    %30 = arith.addf %24, %29 : vector<8x256xf32>
    %cst = arith.constant dense<0.000000e+00> : vector<256xf32>
    %31 = vector.multi_reduction <add>, %30, %cst [0] : vector<8x256xf32> to vector<256xf32>
    %32 = vector.shape_cast %31 : vector<256xf32> to vector<1x256xf32>
    %cst_3 = arith.constant 8.000000e+00 : f32
    %33 = vector.broadcast %cst_3 : f32 to vector<1x256xf32>
    %34 = arith.divf %32, %33 : vector<1x256xf32>
    %35 = vector.broadcast %34 : vector<1x256xf32> to vector<8x256xf32>
    %36 = arith.subf %30, %35 : vector<8x256xf32>
    %37 = arith.mulf %36, %36 : vector<8x256xf32>
    %cst_4 = arith.constant dense<0.000000e+00> : vector<256xf32>
    %38 = vector.multi_reduction <add>, %37, %cst_4 [0] : vector<8x256xf32> to vector<256xf32>
    %39 = vector.shape_cast %38 : vector<256xf32> to vector<1x256xf32>
    %cst_5 = arith.constant 8.000000e+00 : f32
    %40 = vector.broadcast %cst_5 : f32 to vector<1x256xf32>
    %41 = arith.divf %39, %40 : vector<1x256xf32>
    %cst_6 = arith.constant 9.99999974E-6 : f32
    %42 = vector.broadcast %cst_6 : f32 to vector<1x256xf32>
    %43 = arith.addf %41, %42 : vector<1x256xf32>
    %44 = math.rsqrt %43 : vector<1x256xf32>
    %45 = vector.broadcast %4 : vector<8x1xf32> to vector<8x256xf32>
    %46 = vector.broadcast %44 : vector<1x256xf32> to vector<8x256xf32>
    %47 = arith.mulf %45, %46 : vector<8x256xf32>
    %48 = arith.mulf %36, %47 : vector<8x256xf32>
    %49 = vector.broadcast %5 : vector<8x1xf32> to vector<8x256xf32>
    %50 = arith.addf %48, %49 : vector<8x256xf32>
    %cst_7 = arith.constant 0.000000e+00 : f32
    %51 = vector.broadcast %cst_7 : f32 to vector<8x256xf32>
    %52 = arith.maximumf %50, %51 : vector<8x256xf32>
    %c0_8 = arith.constant 0 : index
    %c0_9 = arith.constant 0 : index
    %53 = vector.load %arg3[%c0_8, %c0_9] : memref<16x11xf32, #tpu.memory_space<vmem>>, vector<16x11xf32>
    %54 = vector.extract_strided_slice %53 {offsets = [0, 0], sizes = [16, 8], strides = [1, 1]} : vector<16x11xf32> to vector<16x8xf32>
    %55 = vector.extract_strided_slice %53 {offsets = [0, 8], sizes = [16, 1], strides = [1, 1]} : vector<16x11xf32> to vector<16x1xf32>
    %56 = vector.extract_strided_slice %53 {offsets = [0, 9], sizes = [16, 1], strides = [1, 1]} : vector<16x11xf32> to vector<16x1xf32>
    %57 = vector.extract_strided_slice %53 {offsets = [0, 10], sizes = [16, 1], strides = [1, 1]} : vector<16x11xf32> to vector<16x1xf32>
    %58 = vector.extract_strided_slice %54 {offsets = [0, 0], sizes = [16, 1], strides = [1, 1]} : vector<16x8xf32> to vector<16x1xf32>
    %59 = vector.extract_strided_slice %52 {offsets = [0, 0], sizes = [1, 256], strides = [1, 1]} : vector<8x256xf32> to vector<1x256xf32>
    %60 = vector.broadcast %58 : vector<16x1xf32> to vector<16x256xf32>
    %61 = vector.broadcast %59 : vector<1x256xf32> to vector<16x256xf32>
    %62 = arith.mulf %60, %61 : vector<16x256xf32>
    %63 = vector.broadcast %55 : vector<16x1xf32> to vector<16x256xf32>
    %64 = arith.addf %63, %62 : vector<16x256xf32>
    %65 = vector.extract_strided_slice %54 {offsets = [0, 1], sizes = [16, 1], strides = [1, 1]} : vector<16x8xf32> to vector<16x1xf32>
    %66 = vector.extract_strided_slice %52 {offsets = [1, 0], sizes = [1, 256], strides = [1, 1]} : vector<8x256xf32> to vector<1x256xf32>
    %67 = vector.broadcast %65 : vector<16x1xf32> to vector<16x256xf32>
    %68 = vector.broadcast %66 : vector<1x256xf32> to vector<16x256xf32>
    %69 = arith.mulf %67, %68 : vector<16x256xf32>
    %70 = arith.addf %64, %69 : vector<16x256xf32>
    %71 = vector.extract_strided_slice %54 {offsets = [0, 2], sizes = [16, 1], strides = [1, 1]} : vector<16x8xf32> to vector<16x1xf32>
    %72 = vector.extract_strided_slice %52 {offsets = [2, 0], sizes = [1, 256], strides = [1, 1]} : vector<8x256xf32> to vector<1x256xf32>
    %73 = vector.broadcast %71 : vector<16x1xf32> to vector<16x256xf32>
    %74 = vector.broadcast %72 : vector<1x256xf32> to vector<16x256xf32>
    %75 = arith.mulf %73, %74 : vector<16x256xf32>
    %76 = arith.addf %70, %75 : vector<16x256xf32>
    %77 = vector.extract_strided_slice %54 {offsets = [0, 3], sizes = [16, 1], strides = [1, 1]} : vector<16x8xf32> to vector<16x1xf32>
    %78 = vector.extract_strided_slice %52 {offsets = [3, 0], sizes = [1, 256], strides = [1, 1]} : vector<8x256xf32> to vector<1x256xf32>
    %79 = vector.broadcast %77 : vector<16x1xf32> to vector<16x256xf32>
    %80 = vector.broadcast %78 : vector<1x256xf32> to vector<16x256xf32>
    %81 = arith.mulf %79, %80 : vector<16x256xf32>
    %82 = arith.addf %76, %81 : vector<16x256xf32>
    %83 = vector.extract_strided_slice %54 {offsets = [0, 4], sizes = [16, 1], strides = [1, 1]} : vector<16x8xf32> to vector<16x1xf32>
    %84 = vector.extract_strided_slice %52 {offsets = [4, 0], sizes = [1, 256], strides = [1, 1]} : vector<8x256xf32> to vector<1x256xf32>
    %85 = vector.broadcast %83 : vector<16x1xf32> to vector<16x256xf32>
    %86 = vector.broadcast %84 : vector<1x256xf32> to vector<16x256xf32>
    %87 = arith.mulf %85, %86 : vector<16x256xf32>
    %88 = arith.addf %82, %87 : vector<16x256xf32>
    %89 = vector.extract_strided_slice %54 {offsets = [0, 5], sizes = [16, 1], strides = [1, 1]} : vector<16x8xf32> to vector<16x1xf32>
    %90 = vector.extract_strided_slice %52 {offsets = [5, 0], sizes = [1, 256], strides = [1, 1]} : vector<8x256xf32> to vector<1x256xf32>
    %91 = vector.broadcast %89 : vector<16x1xf32> to vector<16x256xf32>
    %92 = vector.broadcast %90 : vector<1x256xf32> to vector<16x256xf32>
    %93 = arith.mulf %91, %92 : vector<16x256xf32>
    %94 = arith.addf %88, %93 : vector<16x256xf32>
    %95 = vector.extract_strided_slice %54 {offsets = [0, 6], sizes = [16, 1], strides = [1, 1]} : vector<16x8xf32> to vector<16x1xf32>
    %96 = vector.extract_strided_slice %52 {offsets = [6, 0], sizes = [1, 256], strides = [1, 1]} : vector<8x256xf32> to vector<1x256xf32>
    %97 = vector.broadcast %95 : vector<16x1xf32> to vector<16x256xf32>
    %98 = vector.broadcast %96 : vector<1x256xf32> to vector<16x256xf32>
    %99 = arith.mulf %97, %98 : vector<16x256xf32>
    %100 = arith.addf %94, %99 : vector<16x256xf32>
    %101 = vector.extract_strided_slice %54 {offsets = [0, 7], sizes = [16, 1], strides = [1, 1]} : vector<16x8xf32> to vector<16x1xf32>
    %102 = vector.extract_strided_slice %52 {offsets = [7, 0], sizes = [1, 256], strides = [1, 1]} : vector<8x256xf32> to vector<1x256xf32>
    %103 = vector.broadcast %101 : vector<16x1xf32> to vector<16x256xf32>
    %104 = vector.broadcast %102 : vector<1x256xf32> to vector<16x256xf32>
    %105 = arith.mulf %103, %104 : vector<16x256xf32>
    %106 = arith.addf %100, %105 : vector<16x256xf32>
    %cst_10 = arith.constant dense<0.000000e+00> : vector<256xf32>
    %107 = vector.multi_reduction <add>, %106, %cst_10 [0] : vector<16x256xf32> to vector<256xf32>
    %108 = vector.shape_cast %107 : vector<256xf32> to vector<1x256xf32>
    %cst_11 = arith.constant 1.600000e+01 : f32
    %109 = vector.broadcast %cst_11 : f32 to vector<1x256xf32>
    %110 = arith.divf %108, %109 : vector<1x256xf32>
    %111 = vector.broadcast %110 : vector<1x256xf32> to vector<16x256xf32>
    %112 = arith.subf %106, %111 : vector<16x256xf32>
    %113 = arith.mulf %112, %112 : vector<16x256xf32>
    %cst_12 = arith.constant dense<0.000000e+00> : vector<256xf32>
    %114 = vector.multi_reduction <add>, %113, %cst_12 [0] : vector<16x256xf32> to vector<256xf32>
    %115 = vector.shape_cast %114 : vector<256xf32> to vector<1x256xf32>
    %cst_13 = arith.constant 1.600000e+01 : f32
    %116 = vector.broadcast %cst_13 : f32 to vector<1x256xf32>
    %117 = arith.divf %115, %116 : vector<1x256xf32>
    %cst_14 = arith.constant 9.99999974E-6 : f32
    %118 = vector.broadcast %cst_14 : f32 to vector<1x256xf32>
    %119 = arith.addf %117, %118 : vector<1x256xf32>
    %120 = math.rsqrt %119 : vector<1x256xf32>
    %121 = vector.broadcast %56 : vector<16x1xf32> to vector<16x256xf32>
    %122 = vector.broadcast %120 : vector<1x256xf32> to vector<16x256xf32>
    %123 = arith.mulf %121, %122 : vector<16x256xf32>
    %124 = arith.mulf %112, %123 : vector<16x256xf32>
    %125 = vector.broadcast %57 : vector<16x1xf32> to vector<16x256xf32>
    %126 = arith.addf %124, %125 : vector<16x256xf32>
    %cst_15 = arith.constant 0.000000e+00 : f32
    %127 = vector.broadcast %cst_15 : f32 to vector<16x256xf32>
    %128 = arith.maximumf %126, %127 : vector<16x256xf32>
    %c0_16 = arith.constant 0 : index
    %c0_17 = arith.constant 0 : index
    %129 = vector.load %arg4[%c0_16, %c0_17] : memref<16x256xf32, #tpu.memory_space<vmem>>, vector<16x256xf32>
    tpu.vector_store %arg4[%c0_16, %c0_17], %128 {strides = array<i32>} : memref<16x256xf32, #tpu.memory_space<vmem>>, vector<16x256xf32>,
    return
  }
  func.func @transform_0(%arg0: i32) -> (i32, i32) {
    %c0_i32 = arith.constant 0 : i32
    %c0_i32_0 = arith.constant 0 : i32
    return %c0_i32, %arg0 : i32, i32
  }
  func.func @transform_1(%arg0: i32) -> (i32, i32) {
    %c0_i32 = arith.constant 0 : i32
    %c0_i32_0 = arith.constant 0 : i32
    %c0_i32_1 = arith.constant 0 : i32
    return %c0_i32, %c0_i32_0 : i32, i32
  }
  func.func @transform_2(%arg0: i32) -> (i32, i32) {
    %c0_i32 = arith.constant 0 : i32
    %c0_i32_0 = arith.constant 0 : i32
    %c0_i32_1 = arith.constant 0 : i32
    return %c0_i32, %c0_i32_0 : i32, i32
  }
  func.func @transform_3(%arg0: i32) -> (i32, i32) {
    %c0_i32 = arith.constant 0 : i32
    %c0_i32_0 = arith.constant 0 : i32
    return %c0_i32, %arg0 : i32, i32
  }
}

</mosaic_0001>

<bundles_post_ra>
// kernel: projector_forward.1
= control target key start
LH: loop header
LB: loop body
LE: loop exit
PB: predicated region body
PF: predicated region fallthrough
CT: control target
= control target key end

     0   :  { %s839_s12 = smov 0   ;;  %s841_s13 = smov 0   ;;  %s974_s0 = inlined_call_operand.vmem [shape: f32[4,512], index: 0, kind: input, shape index: {}]   ;;  %s975_s1 = inlined_call_operand.vmem [shape: f32[8,7], index: 1, kind: input, shape index: {}]   ;;  %s976_s2 = inlined_call_operand.vmem [shape: f32[16,11], index: 2, kind: input, shape index: {}]   ;;  %s977_s3 = inlined_call_operand.vmem [shape: f32[16,512], index: 3, kind: output, shape index: {}]  }
   0x1   :  { %s843_s14 = smov 0  }
   0x2 LB: > { %s852_s15 = sadd.s32 4294967295, %s806_s14   ;;  %s854_s16 = sadd.s32 1, %s806_s14   ;;  %s806_s14 = sphi %s843_s14, %s981_s14   ;;  %s802_s13 = sphi %s841_s13, %s980_s13   ;;  %s798_s12 = sphi %s839_s12, %s979_s12  }
   0x3   : > { %s85_s17 = ssub.s32 %s806_s14, %s854_s16  ;;  %s88_s18 = sadd.s32 1, %s802_s13 }
   0x4   : > { %p86_p0 = scmp.eq.s32.totalorder %s85_s17, 0  ;;  %p98_p1 = scmp.ne.s32.totalorder %s802_s13, %s798_s12 }
   0x5   : > { %p99_p2 = scmp.eq.s32.totalorder %s852_s15, 1  ;;  %p705_p3 = scmp.ge.s32.totalorder %s806_s14, 1 }
   0x6   : > { %s862_s19 = scalar_select %p86_p0, %s802_s13, %s88_s18  }
   0x7   : > { %p864_p4 = por %p99_p2, %p98_p1  ;;  %p138_p5 = scmp.lt.s32.totalorder %s806_s14, 3 }
   0x9   : > { %p139_p6 = pnand %p705_p3, %p138_p5 }
   0xa   : > { %v169_v0 = vld [vmem:[%s975_s1] sm:$0xff] (!%p139_p6)  ;;  %v808_v1 = vmov (!%p139_p6), 1   ;;  %v809_v2 = vmov (!%p139_p6), 0   ;;  %v810_v3 = vmov (!%p139_p6), 2   ;;  %v811_v4 = vmov (!%p139_p6), 4   ;;  %v334_v8 = vld [vmem:[%s976_s2 + $0x8] sm:$0xff] (!%p139_p6) }
   0xb   : > { %142 = sbr.rel (%p139_p6) target bundleno = 295 (0x127), region = 32  ;;  %752 = vset.pattern.permute.xlu1 (!%p139_p6), %v808_v1  ;;  %750 = vset.pattern.permute.xlu0 (!%p139_p6), %v809_v2  ;;  %v812_v5 = vmov (!%p139_p6), 3   ;;  %v813_v6 = vmov (!%p139_p6), 5   ;;  %v814_v7 = vmov (!%p139_p6), 6   ;;  %v333_v9 = vld [vmem:[%s976_s2] sm:$0xff] (!%p139_p6)  ;;  %v815_v10 = vmov (!%p139_p6), 8  }
   0xc   : > { %203 = vperm.xlu1 (!%p139_p6), %752, %v169_v0   ;;  %172 = vperm.xlu0 (!%p139_p6), %750, %v169_v0   ;;  %v816_v11 = vmov (!%p139_p6), 7   ;;  %v817_v12 = vmov (!%p139_p6), 9   ;;  %v818_v13 = vmov (!%p139_p6), 10   ;;  %s707_s27 = sshll.u32 (!%p139_p6), %s852_s15, 1  ;;  %v176_v14 = vlaneseq (!%p139_p6)  ;;  %s158_s5 = sand.u32 (!%p139_p6), 1, %s798_s12  }
   0xd   : > { %p162_p7 = scmp.lt.s32.totalorder (!%p139_p6), %s707_s27, 3  ;;  %s706_s6 = sshll.u32 (!%p139_p6), %s158_s5, 5 }
   0xe   : > { %v177_v15 = vshrl.u32 (!%p139_p6), %v176_v14, 7  ;;  %s160_s7 = scalar_lea.vmem (!%p139_p6), [#allocation2], %s706_s6 }
  0x10   : > { %753 = vset.pattern.permute.xlu1 (!%p139_p6), %v810_v3  ;;  %751 = vset.pattern.permute.xlu0 (!%p139_p6), %v811_v4  ;;  %v881_v16 = vsub.s32 (!%p139_p6), 0, %v177_v15  ;;  %v883_v17 = vsub.s32 (!%p139_p6), 4, %v177_v15  ;;  %v885_v19 = vsub.s32 (!%p139_p6), 1, %v177_v15  ;;  %v887_v20 = vsub.s32 (!%p139_p6), 5, %v177_v15 }
  0x11   : > { %229 = vperm.xlu1 (!%p139_p6), %753, %v169_v0   ;;  %197 = vperm.xlu0 (!%p139_p6), %751, %v169_v0   ;;  %v891_v23 = vsub.s32 (!%p139_p6), 2, %v177_v15  ;;  %v893_v24 = vsub.s32 (!%p139_p6), 6, %v177_v15  ;;  %v897_v27 = vsub.s32 (!%p139_p6), 3, %v177_v15  ;;  %v899_v28 = vsub.s32 (!%p139_p6), 7, %v177_v15 }
  0x12   : > { %s983_s27 = smov (!%p162_p7, %s707_s27), 3  ;;  %s714_s8 = sshll.u32 (%p864_p4), %s852_s15, 4 }
  0x13   : > { %s708_s28 = sshll.u32 %s983_s27, 2  ;;  %s627_s11 = scalar_lea.vmem (%p864_p4), %s977_s3, %s714_s8 }
  0x14   : > { %s165_s4 = scalar_lea.vmem %s974_s0, %s708_s28 }
  0x15   : > { %754 = vset.pattern.permute.xlu1 %v812_v5  ;;  %755 = vset.pattern.permute.xlu0 %v813_v6  ;;  %v168_v18 = vld [vmem:[%s165_s4] sm:$0xff] }
  0x16   : > { %255 = vperm.xlu1 %754, %v169_v0   ;;  %318 = vperm.xlu0 %755, %v169_v0   ;;  %v179_v21 = vrot.slane %v168_v18, %v881_v16  ;;  %v183_v22 = vrot.slane %v168_v18, %v883_v17  ;;  %v209_v25 = vrot.slane %v168_v18, %v885_v19 }
  0x17   : > { %v213_v26 = vrot.slane %v168_v18, %v887_v20  ;;  %v235_v33 = vrot.slane %v168_v18, %v891_v23  ;;  %v239_v34 = vrot.slane %v168_v18, %v893_v24  ;;  %v261_v37 = vrot.slane %v168_v18, %v897_v27 }
  0x18   : > { %v189_v31 = vrot.slane %v179_v21, %v881_v16  ;;  %v193_v32 = vrot.slane %v183_v22, %v881_v16  ;;  %v219_v35 = vrot.slane %v209_v25, %v885_v19  ;;  %v265_v38 = vrot.slane %v168_v18, %v899_v28 }
  0x19   : > { %v223_v36 = vrot.slane %v213_v26, %v885_v19  ;;  %v245_v41 = vrot.slane %v235_v33, %v891_v23  ;;  %v249_v42 = vrot.slane %v239_v34, %v891_v23  ;;  %v271_v49 = vrot.slane %v261_v37, %v897_v27 }
  0x1a   : > { %756 = vset.pattern.permute.xlu1 %v814_v7  ;;  %758 = vset.pattern.permute.xlu0 %v809_v2  ;;  %v275_v50 = vrot.slane %v265_v38, %v897_v27 }
  0x1b   : > { %326 = vperm.xlu1 %756, %v169_v0   ;;  %342 = vperm.xlu0 %758, %v334_v8  }
  0x1f   : > { %757 = vset.pattern.permute.xlu1 %v809_v2  ;;  %760 = vset.pattern.permute.xlu0 %v808_v1 }
  0x20   : > { %337 = vperm.xlu1 %757, %v333_v9   ;;  %370 = vperm.xlu0 %760, %v333_v9  }
  0x24   : > { %759 = vset.pattern.permute.xlu1 %v815_v10  ;;  %763 = vset.pattern.permute.xlu0 %v810_v3 }
  0x25   : > { %358 = vperm.xlu1 %759, %v333_v9   ;;  %398 = vperm.xlu0 %763, %v334_v8  }
  0x29   : > { %362 = vperm.xlu1 %759, %v334_v8   ;;  %765 = vset.pattern.permute.xlu0 %v811_v4 }
  0x2a   : > { %442 = vperm.xlu0 %765, %v333_v9  }
  0x2d   : > { %761 = vset.pattern.permute.xlu1 %v808_v1 }
  0x2e   : > { %374 = vperm.xlu1 %761, %v334_v8   ;;  %768 = vset.pattern.permute.xlu0 %v813_v6 }
  0x2f   : > { %470 = vperm.xlu0 %768, %v334_v8  }
  0x32   : > { %762 = vset.pattern.permute.xlu1 %v810_v3 }
  0x33   : > { %394 = vperm.xlu1 %762, %v333_v9   ;;  %770 = vset.pattern.permute.xlu0 %v816_v11 }
  0x34   : > { %514 = vperm.xlu0 %770, %v333_v9  }
  0x37   : > { %764 = vset.pattern.permute.xlu1 %v812_v5 }
  0x38   : > { %418 = vperm.xlu1 %764, %v333_v9   ;;  %773 = vset.pattern.permute.xlu0 %v817_v12 }
  0x39   : > { %587 = vperm.xlu0 %773, %v334_v8  }
  0x3c   : > { %422 = vperm.xlu1 %764, %v334_v8  }
  0x3d   : > { %775 = vset.pattern.permute.xlu0 %v818_v13 }
  0x40   : > { %766 = vset.pattern.permute.xlu1 %v811_v4 }
  0x41   : > { %446 = vperm.xlu1 %766, %v334_v8  }
  0x45   : > { %767 = vset.pattern.permute.xlu1 %v813_v6 }
  0x46   : > { %466 = vperm.xlu1 %767, %v333_v9  }
  0x4a   : > { %769 = vset.pattern.permute.xlu1 %v814_v7 }
  0x4b   : > { %490 = vperm.xlu1 %769, %v333_v9  }
  0x4f   : > { %494 = vperm.xlu1 %769, %v334_v8  }
  0x53   : > { %771 = vset.pattern.permute.xlu1 %v816_v11 }
  0x54   : > { %518 = vperm.xlu1 %771, %v334_v8  }
  0x58   : > { %772 = vset.pattern.permute.xlu1 %v817_v12 }
  0x59   : > { %583 = vperm.xlu1 %772, %v333_v9  }
  0x5d   : > { %774 = vset.pattern.permute.xlu1 %v818_v13 }
  0x5e   : > { %599 = vperm.xlu1 %774, %v333_v9  }
  0x62   : > { %603 = vperm.xlu1 %774, %v334_v8  }
  0x8b   : > { %v204_v29 = vpop.permute.xlu1 %203  ;;  %v173_v30 = vpop.permute.xlu0 %172 }
  0x8c   : > { %v194_v39 = vmul.f32 %v189_v31, %v173_v30  ;;  %v195_v40 = vmul.f32 %v193_v32, %v173_v30  ;;  %v224_v45 = vmul.f32 %v219_v35, %v204_v29  ;;  %v225_v46 = vmul.f32 %v223_v36, %v204_v29 }
  0x90   : > { %v230_v43 = vpop.permute.xlu1 %229  ;;  %v198_v44 = vpop.permute.xlu0 %197 }
  0x91   : > { %v200_v47 = vadd.f32 %v198_v44, %v194_v39  ;;  %v201_v48 = vadd.f32 %v198_v44, %v195_v40  ;;  %v250_v51 = vmul.f32 %v245_v41, %v230_v43  ;;  %v251_v52 = vmul.f32 %v249_v42, %v230_v43 }
  0x93   : > { %v226_v53 = vadd.f32 %v224_v45, %v200_v47  ;;  %v227_v54 = vadd.f32 %v225_v46, %v201_v48 }
  0x95   : > { %v252_v55 = vadd.f32 %v250_v51, %v226_v53  ;;  %v253_v56 = vadd.f32 %v251_v52, %v227_v54  ;;  %v256_v57 = vpop.permute.xlu1 %255  ;;  %v319_v44 = vpop.permute.xlu0 %318 }
  0x96   : > { %v276_v58 = vmul.f32 %v271_v49, %v256_v57  ;;  %v277_v59 = vmul.f32 %v275_v50, %v256_v57 }
  0x98   : > { %v278_v60 = vadd.f32 %v276_v58, %v252_v55  ;;  %v279_v61 = vadd.f32 %v277_v59, %v253_v56 }
  0x9a   : > { %v280_v62 = vrot.slane %v278_v60, 4  ;;  %v286_v63 = vrot.slane %v279_v61, 4  ;;  %v327_v0 = vpop.permute.xlu1 %326  ;;  %v343_v48 = vpop.permute.xlu0 %342 }
  0x9c   : > { %v281_v1 = vadd.f32 %v280_v62, %v278_v60  ;;  %v287_v2 = vadd.f32 %v286_v63, %v279_v61 }
  0x9e   : > { %v282_v3 = vrot.slane %v281_v1, 2  ;;  %v288_v4 = vrot.slane %v287_v2, 2 }
  0x9f   : > { %v338_v5 = vpop.permute.xlu1 %337  ;;  %v371_v51 = vpop.permute.xlu0 %370 }
  0xa0   : > { %v283_v6 = vadd.f32 %v282_v3, %v281_v1  ;;  %v289_v7 = vadd.f32 %v288_v4, %v287_v2 }
  0xa2   : > { %v284_v8 = vrot.slane %v283_v6, 1  ;;  %v290_v9 = vrot.slane %v289_v7, 1 }
  0xa4   : > { %v913_v10 = vpop.permute.xlu1 %358  ;;  %v285_v11 = vadd.f32 %v284_v8, %v283_v6  ;;  %v291_v12 = vadd.f32 %v290_v9, %v289_v7 }
  0xa6   : > { %v293_v13 = vmul.f32 0.125, %v285_v11  ;;  %v294_v14 = vmul.f32 0.125, %v291_v12 }
  0xa8   : > { %v363_v15 = vpop.permute.xlu1 %362  ;;  %v295_v18 = vsub.f32 %v278_v60, %v293_v13  ;;  %v296_v21 = vsub.f32 %v279_v61, %v294_v14  ;;  %v399_v60 = vpop.permute.xlu0 %398 }
  0xaa   : > { %v297_v22 = vmul.f32 %v295_v18, %v295_v18  ;;  %v298_v25 = vmul.f32 %v296_v21, %v296_v21 }
  0xac   : > { %v299_v26 = vrot.slane %v297_v22, 4  ;;  %v305_v29 = vrot.slane %v298_v25, 4 }
  0xad   : > { %v375_v30 = vpop.permute.xlu1 %374 }
  0xae   : > { %v300_v31 = vadd.f32 %v299_v26, %v297_v22  ;;  %v306_v32 = vadd.f32 %v305_v29, %v298_v25 }
  0xb0   : > { %v301_v33 = vrot.slane %v300_v31, 2  ;;  %v307_v34 = vrot.slane %v306_v32, 2 }
  0xb2   : > { %v302_v35 = vadd.f32 %v301_v33, %v300_v31  ;;  %v308_v36 = vadd.f32 %v307_v34, %v306_v32  ;;  %v915_v37 = vpop.permute.xlu1 %394 }
  0xb4   : > { %v303_v38 = vrot.slane %v302_v35, 1  ;;  %v309_v39 = vrot.slane %v308_v36, 1 }
  0xb6   : > { %v304_v40 = vadd.f32 %v303_v38, %v302_v35  ;;  %v310_v41 = vadd.f32 %v309_v39, %v308_v36 }
  0xb7   : > { %v419_v47 = vpop.permute.xlu1 %418 }
  0xb8   : > { %v311_v42 = vmul.f32 0.125, %v304_v40  ;;  %v312_v43 = vmul.f32 0.125, %v310_v41 }
  0xba   : > { %v313_v45 = vadd.f32 1e-05, %v311_v42  ;;  %v314_v46 = vadd.f32 1e-05, %v312_v43 }
  0xbb   : > { %v423_v49 = vpop.permute.xlu1 %422 }
  0xbc   : > { %776 = vrsqrt.f32 %v313_v45 }
  0xbd   : > { %778 = vrsqrt.f32 %v314_v46 }
  0xc0   : > { %v447_v52 = vpop.permute.xlu1 %446 }
  0xc5   : > { %v467_v61 = vpop.permute.xlu1 %466 }
  0xc6   : > { %v777_v50 = vpop.eup %776 }
  0xc7   : > { %v779_v53 = vpop.eup %778  ;;  %v321_v54 = vmul.f32 %v777_v50, %v319_v44 }
  0xc8   : > { %v322_v55 = vmul.f32 %v779_v53, %v319_v44 }
  0xc9   : > { %v323_v56 = vmul.f32 %v321_v54, %v295_v18 }
  0xca   : > { %v324_v57 = vmul.f32 %v322_v55, %v296_v21  ;;  %v491_v14 = vpop.permute.xlu1 %490 }
  0xcb   : > { %v329_v58 = vadd.f32 %v327_v0, %v323_v56 }
  0xcc   : > { %v330_v59 = vadd.f32 %v327_v0, %v324_v57 }
  0xcd   : > { %v917_v62 = vmax.f32 %v329_v58, 0.0 }
  0xce   : > { %v919_v63 = vmax.f32 %v330_v59, 0.0  ;;  %v495_v44 = vpop.permute.xlu1 %494 }
  0xcf   : > { %v348_v1 = vrot.slane %v917_v62, %v881_v16  ;;  %v380_v2 = vrot.slane %v917_v62, %v885_v19  ;;  %v428_v0 = vrot.slane %v917_v62, %v897_v27  ;;  %v452_v8 = vrot.slane %v917_v62, %v883_v17 }
  0xd0   : > { %v352_v3 = vrot.slane %v919_v63, %v881_v16  ;;  %v384_v4 = vrot.slane %v919_v63, %v885_v19  ;;  %v432_v9 = vrot.slane %v919_v63, %v897_v27  ;;  %v456_v13 = vrot.slane %v919_v63, %v883_v17  ;;  %v443_v16 = vpop.permute.xlu0 %442 }
  0xd1   : > { %v353_v6 = vmul.f32 %v348_v1, %v338_v5  ;;  %v355_v7 = vmul.f32 %v348_v1, %v343_v48  ;;  %v385_v21 = vmul.f32 %v380_v2, %v371_v51  ;;  %v387_v29 = vmul.f32 %v380_v2, %v375_v30 }
  0xd2   : > { %v354_v11 = vmul.f32 %v352_v3, %v338_v5  ;;  %v356_v12 = vmul.f32 %v352_v3, %v343_v48  ;;  %v386_v22 = vmul.f32 %v384_v4, %v371_v51  ;;  %v388_v31 = vmul.f32 %v384_v4, %v375_v30 }
  0xd3   : > { %v367_v18 = vadd.f32 %v363_v15, %v355_v7  ;;  %v365_v19 = vadd.f32 %v913_v10, %v353_v6  ;;  %v433_v32 = vmul.f32 %v428_v0, %v419_v47  ;;  %v435_v33 = vmul.f32 %v428_v0, %v423_v49  ;;  %v519_v7 = vpop.permute.xlu1 %518 }
  0xd4   : > { %v368_v25 = vadd.f32 %v363_v15, %v356_v12  ;;  %v366_v26 = vadd.f32 %v913_v10, %v354_v11  ;;  %v404_v5 = vrot.slane %v917_v62, %v891_v23  ;;  %v408_v36 = vrot.slane %v919_v63, %v891_v23  ;;  %v471_v43 = vpop.permute.xlu0 %470 }
  0xd5   : > { %v389_v27 = vadd.f32 %v385_v21, %v365_v19  ;;  %v391_v17 = vadd.f32 %v387_v29, %v367_v18  ;;  %v434_v38 = vmul.f32 %v432_v9, %v419_v47  ;;  %v476_v10 = vrot.slane %v917_v62, %v887_v20 }
  0xd6   : > { %v390_v34 = vadd.f32 %v386_v22, %v366_v26  ;;  %v392_v35 = vadd.f32 %v388_v31, %v368_v25  ;;  %v409_v39 = vmul.f32 %v404_v5, %v915_v37  ;;  %v411_v15 = vmul.f32 %v404_v5, %v399_v60 }
  0xd7   : > { %v436_v30 = vmul.f32 %v432_v9, %v423_v49  ;;  %v410_v40 = vmul.f32 %v408_v36, %v915_v37  ;;  %v412_v41 = vmul.f32 %v408_v36, %v399_v60  ;;  %v480_v42 = vrot.slane %v919_v63, %v887_v20 }
  0xd8   : > { %v459_v45 = vmul.f32 %v452_v8, %v447_v52  ;;  %v460_v46 = vmul.f32 %v456_v13, %v447_v52  ;;  %v415_v48 = vadd.f32 %v411_v15, %v391_v17  ;;  %v413_v23 = vadd.f32 %v409_v39, %v389_v27  ;;  %v515_v4 = vpop.permute.xlu0 %514 }
  0xd9   : > { %v416_v47 = vadd.f32 %v412_v41, %v392_v35  ;;  %v414_v50 = vadd.f32 %v410_v40, %v390_v34  ;;  %v457_v51 = vmul.f32 %v452_v8, %v443_v16  ;;  %v458_v53 = vmul.f32 %v456_v13, %v443_v16 }
  0xda   : > { %v439_v54 = vadd.f32 %v435_v33, %v415_v48  ;;  %v481_v55 = vmul.f32 %v476_v10, %v467_v61  ;;  %v437_v56 = vadd.f32 %v433_v32, %v413_v23  ;;  %v500_v37 = vrot.slane %v917_v62, %v893_v24 }
  0xdb   : > { %v440_v49 = vadd.f32 %v436_v30, %v416_v47  ;;  %v482_v57 = vmul.f32 %v480_v42, %v467_v61  ;;  %v438_v58 = vadd.f32 %v434_v38, %v414_v50  ;;  %v504_v20 = vrot.slane %v919_v63, %v893_v24 }
  0xdc   : > { %v461_v59 = vadd.f32 %v457_v51, %v437_v56  ;;  %v463_v52 = vadd.f32 %v459_v45, %v439_v54  ;;  %v483_v60 = vmul.f32 %v476_v10, %v471_v43  ;;  %v484_v1 = vmul.f32 %v480_v42, %v471_v43 }
  0xdd   : > { %v462_v2 = vadd.f32 %v458_v53, %v438_v58  ;;  %v464_v3 = vadd.f32 %v460_v46, %v440_v49  ;;  %v524_v0 = vrot.slane %v917_v62, %v899_v28  ;;  %v528_v6 = vrot.slane %v919_v63, %v899_v28 }
  0xde   : > { %v485_v8 = vadd.f32 %v481_v55, %v461_v59  ;;  %v505_v61 = vmul.f32 %v500_v37, %v491_v14  ;;  %v487_v9 = vadd.f32 %v483_v60, %v463_v52  ;;  %v507_v11 = vmul.f32 %v500_v37, %v495_v44 }
  0xdf   : > { %v486_v12 = vadd.f32 %v482_v57, %v462_v2  ;;  %v506_v24 = vmul.f32 %v504_v20, %v491_v14  ;;  %v488_v13 = vadd.f32 %v484_v1, %v464_v3  ;;  %v508_v16 = vmul.f32 %v504_v20, %v495_v44 }
  0xe0   : > { %v509_v18 = vadd.f32 %v505_v61, %v485_v8  ;;  %v511_v19 = vadd.f32 %v507_v11, %v487_v9  ;;  %v529_v21 = vmul.f32 %v524_v0, %v515_v4  ;;  %v531_v22 = vmul.f32 %v524_v0, %v519_v7  ;;  %v588_v8 = vpop.permute.xlu0 %587 }
  0xe1   : > { %v510_v25 = vadd.f32 %v506_v24, %v486_v12  ;;  %v512_v26 = vadd.f32 %v508_v16, %v488_v13  ;;  %v530_v29 = vmul.f32 %v528_v6, %v515_v4  ;;  %v532_v62 = vmul.f32 %v528_v6, %v519_v7  ;;  %v584_v6 = vpop.permute.xlu1 %583 }
  0xe2   : > { %v533_v31 = vadd.f32 %v529_v21, %v509_v18  ;;  %v535_v32 = vadd.f32 %v531_v22, %v511_v19 }
  0xe3   : > { %v534_v28 = vadd.f32 %v530_v29, %v510_v25  ;;  %v536_v63 = vadd.f32 %v532_v62, %v512_v26 }
  0xe4   : > { %v537_v33 = vadd.f32 %v535_v32, %v533_v31 }
  0xe5   : > { %v544_v27 = vadd.f32 %v536_v63, %v534_v28  ;;  %v600_v7 = vpop.permute.xlu1 %599 }
  0xe6   : > { %v538_v5 = vrot.slane %v537_v33, 4 }
  0xe7   : > { %v545_v34 = vrot.slane %v544_v27, 4 }
  0xe8   : > { %v539_v17 = vadd.f32 %v538_v5, %v537_v33 }
  0xe9   : > { %v546_v14 = vadd.f32 %v545_v34, %v544_v27  ;;  %v604_v21 = vpop.permute.xlu1 %603 }
  0xea   : > { %v540_v35 = vrot.slane %v539_v17, 2 }
  0xeb   : > { %v547_v36 = vrot.slane %v546_v14, 2 }
  0xec   : > { %v541_v38 = vadd.f32 %v540_v35, %v539_v17 }
  0xed   : > { %v548_v39 = vadd.f32 %v547_v36, %v546_v14 }
  0xee   : > { %v542_v15 = vrot.slane %v541_v38, 1 }
  0xef   : > { %v549_v10 = vrot.slane %v548_v39, 1 }
  0xf0   : > { %v543_v30 = vadd.f32 %v542_v15, %v541_v38 }
  0xf1   : > { %v550_v40 = vadd.f32 %v549_v10, %v548_v39 }
  0xf2   : > { %v552_v41 = vmul.f32 0.0625, %v543_v30 }
  0xf3   : > { %v553_v42 = vmul.f32 0.0625, %v550_v40 }
  0xf4   : > { %v554_v43 = vsub.f32 %v533_v31, %v552_v41  ;;  %v556_v44 = vsub.f32 %v535_v32, %v552_v41 }
  0xf5   : > { %v555_v45 = vsub.f32 %v534_v28, %v553_v42  ;;  %v557_v46 = vsub.f32 %v536_v63, %v553_v42 }
  0xf6   : > { %v558_v48 = vmul.f32 %v554_v43, %v554_v43  ;;  %v560_v23 = vmul.f32 %v556_v44, %v556_v44 }
  0xf7   : > { %v559_v47 = vmul.f32 %v555_v45, %v555_v45  ;;  %v561_v50 = vmul.f32 %v557_v46, %v557_v46 }
  0xf8   : > { %v562_v51 = vadd.f32 %v560_v23, %v558_v48 }
  0xf9   : > { %v569_v53 = vadd.f32 %v561_v50, %v559_v47 }
  0xfa   : > { %v563_v54 = vrot.slane %v562_v51, 4 }
  0xfb   : > { %v570_v55 = vrot.slane %v569_v53, 4 }
  0xfc   : > { %v564_v56 = vadd.f32 %v563_v54, %v562_v51 }
  0xfd   : > { %v571_v37 = vadd.f32 %v570_v55, %v569_v53 }
  0xfe   : > { %v565_v49 = vrot.slane %v564_v56, 2 }
  0xff   : > { %v572_v57 = vrot.slane %v571_v37, 2 }
 0x100   : > { %v566_v58 = vadd.f32 %v565_v49, %v564_v56 }
 0x101   : > { %v573_v20 = vadd.f32 %v572_v57, %v571_v37 }
 0x102   : > { %v567_v59 = vrot.slane %v566_v58, 1 }
 0x103   : > { %v574_v52 = vrot.slane %v573_v20, 1 }
 0x104   : > { %v568_v60 = vadd.f32 %v567_v59, %v566_v58 }
 0x105   : > { %v575_v1 = vadd.f32 %v574_v52, %v573_v20 }
 0x106   : > { %v576_v2 = vmul.f32 0.0625, %v568_v60 }
 0x107   : > { %v577_v3 = vmul.f32 0.0625, %v575_v1 }
 0x108   : > { %v578_v4 = vadd.f32 1e-05, %v576_v2 }
 0x109   : > { %v579_v0 = vadd.f32 1e-05, %v577_v3 }
 0x10a   : > { %780 = vrsqrt.f32 %v578_v4 }
 0x10b   : > { %782 = vrsqrt.f32 %v579_v0 }
 0x114   : > { %v781_v61 = vpop.eup %780 }
 0x115   : > { %v783_v9 = vpop.eup %782  ;;  %v590_v11 = vmul.f32 %v781_v61, %v584_v6  ;;  %v592_v12 = vmul.f32 %v781_v61, %v588_v8 }
 0x116   : > { %v591_v24 = vmul.f32 %v783_v9, %v584_v6  ;;  %v593_v13 = vmul.f32 %v783_v9, %v588_v8 }
 0x117   : > { %v594_v16 = vmul.f32 %v590_v11, %v554_v43  ;;  %v596_v18 = vmul.f32 %v592_v12, %v556_v44 }
 0x118   : > { %v595_v19 = vmul.f32 %v591_v24, %v555_v45  ;;  %v597_v22 = vmul.f32 %v593_v13, %v557_v46  ;;  %624 = sbr.rel (!%p864_p4) target bundleno = 295 (0x127), region = 36 }
 0x119   : > { %v606_v25 = vadd.f32 %v600_v7, %v594_v16  ;;  %v608_v26 = vadd.f32 %v604_v21, %v596_v18 }
 0x11a   : > { %v607_v29 = vadd.f32 %v600_v7, %v595_v19  ;;  %v609_v62 = vadd.f32 %v604_v21, %v597_v22 }
 0x11b   : > { %v610_v31 = vmax.f32 %v606_v25, 0.0  ;;  %v612_v32 = vmax.f32 %v608_v26, 0.0 }
 0x11c   : > { %v611_v28 = vmax.f32 %v607_v29, 0.0  ;;  %v613_v63 = vmax.f32 %v609_v62, 0.0 }
 0x11d   : > { %614 = vst [vmem:[%s160_s7] sm:$0xff] %v610_v31  ;;  %616 = vst [vmem:[%s160_s7 + $0x10] sm:$0xff] %v612_v32 }
 0x11e   : > { %615 = vst [vmem:[%s160_s7 + $0x8] sm:$0xff] %v611_v28  ;;  %617 = vst [vmem:[%s160_s7 + $0x18] sm:$0xff] %v613_v63 }
 0x124   : > { %v640_v33 = vld [vmem:[%s160_s7] sm:$0xff]  ;;  %v644_v5 = vld [vmem:[%s160_s7 + $0x10] sm:$0xff] }
 0x125   : > { %v642_v27 = vld [vmem:[%s160_s7 + $0x8] sm:$0xff]  ;;  %v646_v34 = vld [vmem:[%s160_s7 + $0x18] sm:$0xff]  ;;  %641 = vst [vmem:[%s627_s11] sm:$0xff] %v640_v33  ;;  %645 = vst [vmem:[%s627_s11 + $0x20] sm:$0xff] %v644_v5 }
 0x126   : > { %643 = vst [vmem:[%s627_s11 + $0x8] sm:$0xff] %v642_v27  ;;  %647 = vst [vmem:[%s627_s11 + $0x28] sm:$0xff] %v646_v34 }
 0x127 PF: > { %p10_p8 = scmp.ge.s32.totalorder %s854_s16, 4   ;;  %s979_s12 = smov %s802_s13 }
 0x128   : > { %s980_s13 = smov %s862_s19  ;;  %s981_s14 = smov %s854_s16 }
 0x129   :  { %12 = sbr.rel (!%p10_p8) target bundleno = 2 (0x2), region = 85 }

</bundles_post_ra>
